<compile_context>
chip_gen: v5e
topology: v5e:2x2
jax: 0.10.0
libtpu: 0.0.40
codegen_flags: <defaults>
</compile_context>

<pallas_src>
import jax
import jax.numpy as jnp
from jax.experimental import pallas as pl
from jax.experimental.pallas import tpu as pltpu


def _round_up(x: int, m: int) -> int:
    return ((x + m - 1) // m) * m


def _classifier_kernel(emb_ref, ker_ref, out_ref, acc_ref, ssq_ref):
    """One (tm, tn) output tile, accumulated over the E (k) grid axis.

    emb_ref: (tm, tk) VMEM      ker_ref: (tk, tn) VMEM
    out_ref: (tm, tn) VMEM      acc_ref: (tm, tn) f32 scratch
    ssq_ref: (1, tn)  f32 scratch (per-column sum of K^2)
    """
    k = pl.program_id(2)

    @pl.when(k == 0)
    def _():
        acc_ref[...] = jnp.zeros_like(acc_ref)
        ssq_ref[...] = jnp.zeros_like(ssq_ref)

    ker = ker_ref[...]
    # MXU matmul, f32 accumulation.
    acc_ref[...] += jnp.dot(
        emb_ref[...], ker, preferred_element_type=jnp.float32
    )
    # Partial column squared-norms of K (tile already resident in VMEM).
    kf = ker.astype(jnp.float32)
    ssq_ref[...] += jnp.sum(kf * kf, axis=0, keepdims=True)

    @pl.when(k == pl.num_programs(2) - 1)
    def _():
        # 1/max(||k_col||, 1e-12)  == rsqrt(max(sum k^2, 1e-24))
        # (matches torch.nn.functional.normalize eps semantics)
        inv_norm = jax.lax.rsqrt(jnp.maximum(ssq_ref[...], 1e-24))  # (1, tn)
        out_ref[...] = (acc_ref[...] * inv_norm).astype(out_ref.dtype)


def classifier_forward(
    embeddings: jax.Array,
    kernel: jax.Array,
    *,
    tm: int = 256,
    tn: int = 512,
    tk: int = 512,
) -> jax.Array:
    """logits = embeddings @ normalize(kernel, dim=0)."""
    B, E = embeddings.shape
    E2, C = kernel.shape
    assert E == E2, "embedding dim mismatch"

    # Clamp tiles to the (alignment-padded) problem size:
    # second-to-last dims multiples of 8, last dims multiples of 128 (lane-dense).
    tm = min(tm, _round_up(B, 8))
    tk = min(tk, _round_up(E, 128))
    tn = min(tn, _round_up(C, 128))

    B_pad = _round_up(B, tm)
    E_pad = _round_up(E, tk)
    C_pad = _round_up(C, tn)

    if (B_pad, E_pad) != (B, E):
        embeddings = jnp.pad(embeddings, ((0, B_pad - B), (0, E_pad - E)))
    if (E_pad, C_pad) != (E, C):
        kernel = jnp.pad(kernel, ((0, E_pad - E), (0, C_pad - C)))

    grid = (B_pad // tm, C_pad // tn, E_pad // tk)

    out = pl.pallas_call(
        _classifier_kernel,
        out_shape=jax.ShapeDtypeStruct((B_pad, C_pad), jnp.float32),
        grid_spec=pltpu.PrefetchScalarGridSpec(
            num_scalar_prefetch=0,
            grid=grid,
            in_specs=[
                # embeddings tile: independent of the C (j) axis -> not re-DMA'd
                # while K tiles stream along j/k.
                pl.BlockSpec((tm, tk), lambda i, j, k: (i, k)),
                pl.BlockSpec((tk, tn), lambda i, j, k: (k, j)),
            ],
            out_specs=pl.BlockSpec((tm, tn), lambda i, j, k: (i, j)),
            scratch_shapes=[
                pltpu.VMEM((tm, tn), jnp.float32),  # matmul accumulator
                pltpu.VMEM((1, tn), jnp.float32),   # per-column sum of K^2
            ],
        ),
        compiler_params=pltpu.CompilerParams(
            dimension_semantics=("parallel", "parallel", "arbitrary"),
            vmem_limit_bytes=32 * 1024 * 1024,  # safe on v5e/v6e/v7x; usage ~5 MiB
        ),
    )(embeddings, kernel)

    # Slice off the alignment padding.
    return out[:B, :C]


def init_classifier_kernel(key, embedding_size: int, num_classes: int) -> jax.Array:
    """Mimics: torch.Tensor(E, C).uniform_(-1, 1).renorm_(2, 1, 1e-5).mul_(1e5)."""
    w = jax.random.uniform(
        key, (embedding_size, num_classes), jnp.float32, minval=-1.0, maxval=1.0
    )
    col_norm = jnp.sqrt(jnp.sum(w * w, axis=0, keepdims=True))
    scale = jnp.where(col_norm > 1e-5, 1e-5 / (col_norm + 1e-7), 1.0)
    return w * scale * 1e5


def classifier_reference(embeddings, kernel):
    inv = 1.0 / jnp.maximum(jnp.linalg.norm(kernel, axis=0, keepdims=True), 1e-12)
    return embeddings @ (kernel * inv)


if __name__ == "__main__":
    key = jax.random.PRNGKey(0)
    k1, k2, k3, k4 = jax.random.split(key, 4)

    # Config 1: the module's toy shapes (wrapper pads E,C up to 128 lanes).
    B, E, C = 8, 32, 16
    emb = jax.random.normal(k1, (B, E), jnp.float32)
    ker = init_classifier_kernel(k2, E, C)
    logits = jax.block_until_ready(classifier_forward(emb, ker))
    ref = classifier_reference(emb, ker)
    assert logits.shape == (B, C)
    assert jnp.allclose(logits, ref, atol=1e-4, rtol=1e-4), "mismatch vs reference (cfg1)"

    # Config 2: small shapes that exercise the multi-tile accumulator path
    # (grid = (1, 3, 2): multiple C tiles and multiple E reduction steps).
    B2, E2, C2 = 8, 256, 384
    emb2 = jax.random.normal(k3, (B2, E2), jnp.float32)
    ker2 = init_classifier_kernel(k4, E2, C2)
    logits2 = jax.block_until_ready(
        classifier_forward(emb2, ker2, tm=8, tn=128, tk=128)
    )
    ref2 = classifier_reference(emb2, ker2)
    assert logits2.shape == (B2, C2)
    assert jnp.allclose(logits2, ref2, atol=5e-4, rtol=5e-4), "mismatch vs reference (cfg2)"

    print("KERNEL_OK")
</pallas_src>

<mosaic_0001>
module attributes {stable_mosaic.version = 11 : i64} {
  func.func @_classifier_kernel(%arg0: i32, %arg1: i32, %arg2: i32, %arg3: memref<8x128xf32, #tpu.memory_space<vmem>>, %arg4: memref<128x128xf32, #tpu.memory_space<vmem>>, %arg5: memref<8x128xf32, #tpu.memory_space<vmem>>, %arg6: memref<8x128xf32, #tpu.memory_space<vmem>>, %arg7: memref<1x128xf32, #tpu.memory_space<vmem>>) attributes {dimension_semantics = [#tpu.dimension_semantics<parallel>, #tpu.dimension_semantics<parallel>, #tpu.dimension_semantics<arbitrary>], iteration_bounds = array<i64: 1, 1, 1>, scalar_prefetch = 0 : i64, scratch_operands = 2 : i64, tpu.core_type = #tpu.core_type<tc>, window_params = [{transform_indices = @transform_0, window_bounds = array<i64: 8, 128>}, {transform_indices = @transform_1, window_bounds = array<i64: 128, 128>}, {transform_indices = @transform_2, window_bounds = array<i64: 8, 128>}]} {
    %c0_i32 = arith.constant 0 : i32
    %0 = arith.cmpi eq, %arg2, %c0_i32 : i32
    %1 = arith.extui %0 : i1 to i32
    %c0_i32_0 = arith.constant 0 : i32
    %2 = arith.cmpi ne, %1, %c0_i32_0 : i32
    scf.if %2 {
      %cst_15 = arith.constant 0.000000e+00 : f32
      %18 = vector.broadcast %cst_15 : f32 to vector<8x128xf32>
      %c0_16 = arith.constant 0 : index
      %c0_17 = arith.constant 0 : index
      %19 = vector.load %arg6[%c0_16, %c0_17] : memref<8x128xf32, #tpu.memory_space<vmem>>, vector<8x128xf32>
      tpu.vector_store %arg6[%c0_16, %c0_17], %18 {strides = array<i32>} : memref<8x128xf32, #tpu.memory_space<vmem>>, vector<8x128xf32>,
      %cst_18 = arith.constant 0.000000e+00 : f32
      %20 = vector.broadcast %cst_18 : f32 to vector<1x128xf32>
      %c0_19 = arith.constant 0 : index
      %c0_20 = arith.constant 0 : index
      %21 = vector.load %arg7[%c0_19, %c0_20] : memref<1x128xf32, #tpu.memory_space<vmem>>, vector<1x128xf32>
      tpu.vector_store %arg7[%c0_19, %c0_20], %20 {strides = array<i32>} : memref<1x128xf32, #tpu.memory_space<vmem>>, vector<1x128xf32>,
    } else {
    }
    %c0 = arith.constant 0 : index
    %c0_1 = arith.constant 0 : index
    %3 = vector.load %arg4[%c0, %c0_1] : memref<128x128xf32, #tpu.memory_space<vmem>>, vector<128x128xf32>
    %c0_2 = arith.constant 0 : index
    %c0_3 = arith.constant 0 : index
    %4 = vector.load %arg6[%c0_2, %c0_3] : memref<8x128xf32, #tpu.memory_space<vmem>>, vector<8x128xf32>
    %c0_4 = arith.constant 0 : index
    %c0_5 = arith.constant 0 : index
    %5 = vector.load %arg3[%c0_4, %c0_5] : memref<8x128xf32, #tpu.memory_space<vmem>>, vector<8x128xf32>
    %cst = arith.constant dense<0.000000e+00> : vector<8x128xf32>
    %6 = tpu.matmul %5, %3, %cst {dimension_numbers = #tpu.dot_dimension_numbers<[1], [0], [0], [1], [0, 0, 1, 1], [], []>} : vector<8x128xf32>, vector<128x128xf32>, vector<8x128xf32> -> vector<8x128xf32>
    %7 = arith.addf %4, %6 : vector<8x128xf32>
    %c0_6 = arith.constant 0 : index
    %c0_7 = arith.constant 0 : index
    %8 = vector.load %arg6[%c0_6, %c0_7] : memref<8x128xf32, #tpu.memory_space<vmem>>, vector<8x128xf32>
    tpu.vector_store %arg6[%c0_6, %c0_7], %7 {strides = array<i32>} : memref<8x128xf32, #tpu.memory_space<vmem>>, vector<8x128xf32>,
    %c0_8 = arith.constant 0 : index
    %c0_9 = arith.constant 0 : index
    %9 = vector.load %arg7[%c0_8, %c0_9] : memref<1x128xf32, #tpu.memory_space<vmem>>, vector<1x128xf32>
    %10 = arith.mulf %3, %3 : vector<128x128xf32>
    %cst_10 = arith.constant dense<0.000000e+00> : vector<128xf32>
    %11 = vector.multi_reduction <add>, %10, %cst_10 [0] : vector<128x128xf32> to vector<128xf32>
    %12 = vector.shape_cast %11 : vector<128xf32> to vector<1x128xf32>
    %13 = arith.addf %9, %12 : vector<1x128xf32>
    %c0_11 = arith.constant 0 : index
    %c0_12 = arith.constant 0 : index
    %14 = vector.load %arg7[%c0_11, %c0_12] : memref<1x128xf32, #tpu.memory_space<vmem>>, vector<1x128xf32>
    tpu.vector_store %arg7[%c0_11, %c0_12], %13 {strides = array<i32>} : memref<1x128xf32, #tpu.memory_space<vmem>>, vector<1x128xf32>,
    %c0_i32_13 = arith.constant 0 : i32
    %15 = arith.cmpi eq, %arg2, %c0_i32_13 : i32
    %16 = arith.extui %15 : i1 to i32
    %c0_i32_14 = arith.constant 0 : i32
    %17 = arith.cmpi ne, %16, %c0_i32_14 : i32
    scf.if %17 {
      %c0_15 = arith.constant 0 : index
      %c0_16 = arith.constant 0 : index
      %18 = vector.load %arg7[%c0_15, %c0_16] : memref<1x128xf32, #tpu.memory_space<vmem>>, vector<1x128xf32>
      %cst_17 = arith.constant 1.000000e-24 : f32
      %19 = vector.broadcast %cst_17 : f32 to vector<1x128xf32>
      %20 = arith.maximumf %18, %19 : vector<1x128xf32>
      %21 = math.rsqrt %20 : vector<1x128xf32>
      %c0_18 = arith.constant 0 : index
      %c0_19 = arith.constant 0 : index
      %22 = vector.load %arg6[%c0_18, %c0_19] : memref<8x128xf32, #tpu.memory_space<vmem>>, vector<8x128xf32>
      %23 = vector.broadcast %21 : vector<1x128xf32> to vector<8x128xf32>
      %24 = arith.mulf %22, %23 : vector<8x128xf32>
      %c0_20 = arith.constant 0 : index
      %c0_21 = arith.constant 0 : index
      %25 = vector.load %arg5[%c0_20, %c0_21] : memref<8x128xf32, #tpu.memory_space<vmem>>, vector<8x128xf32>
      tpu.vector_store %arg5[%c0_20, %c0_21], %24 {strides = array<i32>} : memref<8x128xf32, #tpu.memory_space<vmem>>, vector<8x128xf32>,
    } else {
    }
    return
  }
  func.func @transform_0(%arg0: i32, %arg1: i32, %arg2: i32) -> (i32, i32) {
    %c0_i32 = arith.constant 0 : i32
    return %arg0, %arg2 : i32, i32
  }
  func.func @transform_1(%arg0: i32, %arg1: i32, %arg2: i32) -> (i32, i32) {
    %c0_i32 = arith.constant 0 : i32
    return %arg2, %arg1 : i32, i32
  }
  func.func @transform_2(%arg0: i32, %arg1: i32, %arg2: i32) -> (i32, i32) {
    %c0_i32 = arith.constant 0 : i32
    return %arg0, %arg1 : i32, i32
  }
}

</mosaic_0001>

<bundles_post_ra>
// kernel: tpu_custom_call.1
= control target key start
LH: loop header
LB: loop body
LE: loop exit
PB: predicated region body
PF: predicated region fallthrough
CT: control target
= control target key end

     0   :  { %7 = vsyncpa [#allocation5], 0  ;;  %s283_s0 = inlined_call_operand.hbm [shape: f32[8,128], index: 0, kind: input, shape index: {}]   ;;  %s284_s1 = inlined_call_operand.hbm [shape: f32[128,128], index: 1, kind: input, shape index: {}]   ;;  %s285_s2 = inlined_call_operand.hbm [shape: f32[8,128], index: 2, kind: output, shape index: {}]  }
   0x1   :  { %8 = vsyncpa [#allocation8], 0 }
   0x2   :  { %9 = vsyncpa [#allocation6], 0  ;;  %s15_s11 = sshll.u32 %s283_s0, 4  ;;  %s253_s12 = smov [#allocation4]   ;;  %s16_s11 = int_to_ptr.hbm [resolvable:$true] %s15_s11 }
   0x3   :  { %s17_s13 = sshll.u32 %s253_s12, 4  ;;  %s25_s16 = sshll.u32 %s284_s1, 4  ;;  %s18_s13 = int_to_ptr.vmem [resolvable:$true] %s17_s13  ;;  %s26_s16 = int_to_ptr.hbm [resolvable:$true] %s25_s16 }
   0x4   :  { %20 = dma.hbm_to_vmem [thread:$0]  %s16_s11, 128, %s18_s13, [#allocation5]  }
   0x5   :  { %s254_s17 = smov [#allocation7]   ;;  %s255_s19 = smov 128  }
   0x6   :  { %s27_s18 = sshll.u32 %s254_s17, 4  ;;  %s256_s20 = smov 8   ;;  %s28_s18 = int_to_ptr.vmem [resolvable:$true] %s27_s18 }
   0x7   :  { %33 = dma.hbm_to_vmem [thread:$0]  %s26_s16, 2048, %s28_s18, [#allocation8], %s255_s19, %s255_s19, %s256_s20  }
   0x8   :  { %247 = dma.done.wait [#allocation5], 128  }
   0x9   :  { %248 = vsyncadd [#allocation5], 4294967168 }
   0xa   :  { %249 = dma.done.wait [#allocation8], 2048  }
   0xb   :  { %250 = vsyncadd [#allocation8], 4294965248  ;;  %v257_v0 = vmov 0.0   ;;  %v63_v1 = vld [vmem:[#allocation7 + $0x78] sm:$0xff]  ;;  %v62_v2 = vld [vmem:[#allocation7 + $0x70] sm:$0xff]  ;;  %s258_s0 = smov [#allocation9]  }
   0xc   :  { %47 = vst [vmem:[#allocation3] sm:$0x1] %v257_v0  ;;  %66 = vmatpush.msra.mxu0 %v63_v1  ;;  %v61_v3 = vld [vmem:[#allocation7 + $0x68] sm:$0xff]  ;;  %v60_v4 = vld [vmem:[#allocation7 + $0x60] sm:$0xff]  ;;  %v50_v7 = vld [vmem:[#allocation7 + $0x10] sm:$0xff]  ;;  %v103_v42 = vmul.f32 %v62_v2, %v62_v2  ;;  %v104_v45 = vmul.f32 %v63_v1, %v63_v1  ;;  %s154_s1 = sshll.u32 %s258_s0, 4  ;;  %s155_s1 = int_to_ptr.vmem [resolvable:$true] %s154_s1 }
   0xd   :  { %v48_v5 = vld [vmem:[#allocation7] sm:$0xff]  ;;  %v49_v6 = vld [vmem:[#allocation7 + $0x8] sm:$0xff]  ;;  %v91_v10 = vmul.f32 %v50_v7, %v50_v7  ;;  %v59_v11 = vld [vmem:[#allocation7 + $0x58] sm:$0xff]  ;;  %v101_v38 = vmul.f32 %v60_v4, %v60_v4  ;;  %v102_v40 = vmul.f32 %v61_v3, %v61_v3  ;;  %s156_s23 = sshll.u32 %s285_s2, 4  ;;  %s157_s23 = int_to_ptr.hbm [resolvable:$true] %s156_s23 }
   0xe   :  { %67 = vmatpush.msra.mxu0 %v62_v2  ;;  %v89_v8 = vmul.f32 %v48_v5, %v48_v5  ;;  %v90_v9 = vmul.f32 %v49_v6, %v49_v6  ;;  %v51_v12 = vld [vmem:[#allocation7 + $0x18] sm:$0xff]  ;;  %v58_v15 = vld [vmem:[#allocation7 + $0x50] sm:$0xff]  ;;  %v52_v16 = vld [vmem:[#allocation7 + $0x20] sm:$0xff]  ;;  %v100_v36 = vmul.f32 %v59_v11, %v59_v11 }
   0xf   :  { %v92_v13 = vmul.f32 %v51_v12, %v51_v12  ;;  %v93_v17 = vmul.f32 %v52_v16, %v52_v16  ;;  %v57_v19 = vld [vmem:[#allocation7 + $0x48] sm:$0xff]  ;;  %v56_v23 = vld [vmem:[#allocation7 + $0x40] sm:$0xff]  ;;  %v54_v24 = vld [vmem:[#allocation7 + $0x30] sm:$0xff]  ;;  %v99_v34 = vmul.f32 %v58_v15, %v58_v15 }
  0x10   :  { %68 = vmatpush.msra.mxu0 %v61_v3  ;;  %v105_v14 = vadd.f32 %v90_v9, %v89_v8  ;;  %v53_v20 = vld [vmem:[#allocation7 + $0x28] sm:$0xff]  ;;  %v95_v25 = vmul.f32 %v54_v24, %v54_v24  ;;  %v55_v27 = vld [vmem:[#allocation7 + $0x38] sm:$0xff]  ;;  %v97_v30 = vmul.f32 %v56_v23, %v56_v23  ;;  %v98_v32 = vmul.f32 %v57_v19, %v57_v19 }
  0x11   :  { %v94_v21 = vmul.f32 %v53_v20, %v53_v20  ;;  %v96_v28 = vmul.f32 %v55_v27, %v55_v27  ;;  %v65_v44 = vld [vmem:[#allocation4] sm:$0xff] }
  0x12   :  { %69 = vmatpush.msra.mxu0 %v60_v4  ;;  %v106_v18 = vadd.f32 %v105_v14, %v91_v10 }
  0x13   :  { %v88_v54 = vld [vmem:[#allocation3] sm:$0x1] }
  0x14   :  { %70 = vmatpush.msra.mxu0 %v59_v11  ;;  %v107_v22 = vadd.f32 %v106_v18, %v92_v13 }
  0x16   :  { %71 = vmatpush.msra.mxu0 %v58_v15  ;;  %v108_v26 = vadd.f32 %v107_v22, %v93_v17 }
  0x18   :  { %72 = vmatpush.msra.mxu0 %v57_v19  ;;  %v109_v29 = vadd.f32 %v108_v26, %v94_v21 }
  0x1a   :  { %73 = vmatpush.msra.mxu0 %v56_v23  ;;  %v110_v31 = vadd.f32 %v109_v29, %v95_v25 }
  0x1c   :  { %74 = vmatpush.msra.mxu0 %v55_v27  ;;  %v111_v33 = vadd.f32 %v110_v31, %v96_v28 }
  0x1e   :  { %75 = vmatpush.msra.mxu0 %v54_v24  ;;  %v112_v35 = vadd.f32 %v111_v33, %v97_v30 }
  0x20   :  { %76 = vmatpush.msra.mxu0 %v53_v20  ;;  %v113_v37 = vadd.f32 %v112_v35, %v98_v32 }
  0x22   :  { %77 = vmatpush.msra.mxu0 %v52_v16  ;;  %v114_v39 = vadd.f32 %v113_v37, %v99_v34 }
  0x24   :  { %78 = vmatpush.msra.mxu0 %v51_v12  ;;  %v115_v41 = vadd.f32 %v114_v39, %v100_v36 }
  0x26   :  { %79 = vmatpush.msra.mxu0 %v50_v7  ;;  %v116_v43 = vadd.f32 %v115_v41, %v101_v38 }
  0x28   :  { %80 = vmatpush.msra.mxu0 %v49_v6  ;;  %v117_v46 = vadd.f32 %v116_v43, %v102_v40 }
  0x2a   :  { %81 = vmatpush.msra.mxu0 %v48_v5  ;;  %v118_v47 = vadd.f32 %v117_v46, %v103_v42 }
  0x2b   :  { %82 = vmatmul.f32.vlgmr.msra.gmra.mxu0 %v65_v44 }
  0x2c   :  { %v119_v48 = vadd.f32 %v118_v47, %v104_v45 }
  0x2e   :  { %v120_v49 = vrot.slane %v119_v48, 4 }
  0x30   :  { %v121_v50 = vadd.f32 %v120_v49, %v119_v48 }
  0x32   :  { %v122_v51 = vrot.slane %v121_v50, 2 }
  0x34   :  { %v123_v52 = vadd.f32 %v122_v51, %v121_v50 }
  0x36   :  { %v124_v53 = vrot.slane %v123_v52, 1 }
  0x38   :  { %v125_v55 = vadd.f32 %v124_v53, %v123_v52 }
  0x3a   :  { %v126_v56 = vadd.f32 %v125_v55, %v88_v54 }
  0x3c   :  { %127 = vst [vmem:[#allocation3] sm:$0x1] %v126_v56 }
  0x43   :  { %v131_v57 = vld [vmem:[#allocation3] sm:$0x1] }
  0x44   :  { %v132_v58 = vmax.f32 %v131_v57, 1e-24 }
  0x46   :  { %173 = vrsqrt.f32 %v132_v58  ;;  %vm139_vm0 = vweird.f32 %v132_v58 }
  0x4c   :  { %v174_v59 = vpop.eup %173 }
  0x4d   :  { %v134_v60 = vmul.f32 %v174_v59, %v132_v58  ;;  %vm140_vm1 = vweird.f32 %v174_v59 }
  0x4e   :  { %vm141_vm2 = vmor %vm139_vm0, %vm140_vm1 }
  0x4f   :  { %v135_v61 = vmul.f32 %v174_v59, %v134_v60 }
  0x51   :  { %v136_v62 = vmul.f32 0.5, %v135_v61 }
  0x53   :  { %v137_v63 = vsub.f32 1.5, %v136_v62 }
  0x55   :  { %v138_v0 = vmul.f32 %v174_v59, %v137_v63 }
  0x57   :  { %v142_v1 = vsel %vm141_vm2, %v174_v59, %v138_v0 }
  0x58   :  { %v145_v2 = vperm.slane %v142_v1, 0 }
  0xa8   :  { %v83_v3 = vpop.f32.mrf.mxu0 }
  0xa9   :  { %v147_v4 = vmul.f32 %v145_v2, %v83_v3 }
  0xab   :  { %148 = vst [vmem:[#allocation9] sm:$0xff] %v147_v4 }
  0xac   :  { %159 = dma.vmem_to_hbm [thread:$0]  %s155_s1, 128, %s157_s23, [#allocation6]  }
  0xad   :  { %251 = dma.done.wait [#allocation6], 128  }
  0xae   :  { %252 = vsyncadd [#allocation6], 4294967168 }
  0xaf   :  { %164 = vsyncpa [#allocation5], 1 }
  0xb0   :  { %165 = vsyncpa [#allocation8], 1 }
  0xb1   :  { %166 = vsyncpa [#allocation6], 1 }

</bundles_post_ra>
